<compile_context>
chip_gen: v7x
topology: tpu7x:2x2x1
jax: 0.10.0
libtpu: 0.0.40
codegen_flags: <defaults>
</compile_context>

<pallas_src>
import functools

import jax
import jax.numpy as jnp
from jax import lax
from jax.experimental import pallas as pl
from jax.experimental.pallas import tpu as pltpu

LANE = 128        # lane width: hidden feature dims padded up to a multiple of this
MAX_TB = 1024     # max batch-tile rows (per-step working set ~<1.5 MiB, VMEM-safe)
MIN_SPLIT = 128   # if the padded batch is >= 2*MIN_SPLIT, use >= 2 grid steps (v7x)


def _round_up(n, m):
    return ((n + m - 1) // m) * m


def _cdiv(a, b):
    return -(-a // b)


def _choose_tiling(batch):
    """Balanced batch tiling: 16-row granularity, >=2 steps for large batches."""
    pb = _round_up(batch, 16)                  # bf16 vregs pack (16,128) sublanes
    n_steps = _cdiv(pb, MAX_TB)
    if pb >= 2 * MIN_SPLIT and n_steps < 2:
        n_steps = 2                            # let both v7x TensorCores work
    tb = _round_up(_cdiv(pb, n_steps), 16)
    grid = _cdiv(pb, tb)
    return tb, grid


def _mlp_kernel(x_ref, w1_ref, b1_ref, w2_ref, b2_ref, w3_ref, b3_ref,
                w4t_ref, b4_ref, o_ref):
    # bf16 MXU operands, f32 accumulation; straight-line so bias broadcasts
    # happen exactly once per grid step.
    h = jnp.dot(x_ref[...], w1_ref[...],
                preferred_element_type=jnp.float32) + b1_ref[...]
    h = jnp.maximum(h, 0.0).astype(jnp.bfloat16)
    h = jnp.dot(h, w2_ref[...],
                preferred_element_type=jnp.float32) + b2_ref[...]
    h = jnp.maximum(h, 0.0).astype(jnp.bfloat16)
    h = jnp.dot(h, w3_ref[...],
                preferred_element_type=jnp.float32) + b3_ref[...]
    h = jnp.maximum(h, 0.0).astype(jnp.bfloat16)
    # Final layer computed transposed: w4t is (A_pad, fc3_pad), h is (tb, fc3_pad);
    # contracting both minor dims (NT matmul) gives (A_pad, tb) directly -> the
    # output store is a tiny lane-dense action-major slab, no transpose op needed.
    out_t = lax.dot_general(
        w4t_ref[...], h,
        dimension_numbers=(((1,), (1,)), ((), ())),
        preferred_element_type=jnp.float32) + b4_ref[...]
    o_ref[...] = out_t                         # (A_pad, tb) f32


@functools.partial(jax.jit, static_argnames=("action_size",))
def dq_network_forward(x, padded_params, *, action_size):
    """x: (batch, state_size) float32. padded_params: from pad_params()."""
    batch, state_size = x.shape
    w1, b1 = padded_params["w1"], padded_params["b1"]
    w2, b2 = padded_params["w2"], padded_params["b2"]
    w3, b3 = padded_params["w3"], padded_params["b3"]
    w4t, b4 = padded_params["w4t"], padded_params["b4"]
    d_in = w1.shape[0]           # state_size rounded up to 8 (NOT 128)
    a_pad = w4t.shape[0]         # action_size rounded up to 8

    tb, grid = _choose_tiling(batch)
    total = grid * tb

    # Narrow input: only cast + small zero-pad (rows to grid*tb, features to d_in).
    xp = jnp.pad(x.astype(jnp.bfloat16),
                 ((0, total - batch), (0, d_in - state_size)))

    in_specs = [pl.BlockSpec((tb, d_in), lambda i: (i, 0))]
    for arr in (w1, b1, w2, b2, w3, b3, w4t, b4):
        # Constant block index -> operand stays VMEM-resident across the grid.
        in_specs.append(pl.BlockSpec(arr.shape, lambda i: (0, 0)))
    out_spec = pl.BlockSpec((None, a_pad, tb), lambda i: (i, 0, 0))

    flops = 2 * total * (w1.shape[0] * w1.shape[1] + w2.shape[0] * w2.shape[1]
                         + w3.shape[0] * w3.shape[1] + w4t.shape[0] * w4t.shape[1])
    bytes_accessed = (
        xp.size * 2                                          # bf16 activations in
        + sum(a.size * 2 for a in (w1, w2, w3, w4t))         # bf16 weights
        + sum(a.size * 4 for a in (b1, b2, b3, b4))          # f32 biases
        + grid * a_pad * tb * 4)                             # f32 action-major out

    out_t = pl.pallas_call(
        _mlp_kernel,
        out_shape=jax.ShapeDtypeStruct((grid, a_pad, tb), jnp.float32),
        grid=(grid,),
        in_specs=in_specs,
        out_specs=out_spec,
        compiler_params=pltpu.CompilerParams(
            dimension_semantics=("parallel",)),   # v7x: batch tiles split over 2 TCs
        cost_estimate=pl.CostEstimate(
            flops=flops, transcendentals=0, bytes_accessed=bytes_accessed),
    )(xp, w1, b1, w2, b2, w3, b3, w4t, b4)

    # Un-transpose the action-major output and slice off padding.
    out = out_t.transpose(0, 2, 1).reshape(total, a_pad)
    return out[:batch, :action_size]


def init_params(key, state_size, action_size, fc1_lay, fc2_lay, fc3_lay):
    """nn.Linear-style init: U(-1/sqrt(fan_in), 1/sqrt(fan_in)); W stored (in, out)."""
    dims = [(state_size, fc1_lay), (fc1_lay, fc2_lay), (fc2_lay, fc3_lay),
            (fc3_lay, action_size)]
    params = {}
    for i, (fan_in, fan_out) in enumerate(dims, start=1):
        key, kw, kb = jax.random.split(key, 3)
        bound = 1.0 / jnp.sqrt(jnp.float32(fan_in))
        params[f"w{i}"] = jax.random.uniform(
            kw, (fan_in, fan_out), jnp.float32, minval=-bound, maxval=bound)
        params[f"b{i}"] = jax.random.uniform(
            kb, (1, fan_out), jnp.float32, minval=-bound, maxval=bound)
    return params


def pad_params(params):
    """Kernel-layout params: bf16 weights, f32 biases.
       w1: (round8(state), 128-pad fc1); w2/w3: 128-pad both dims;
       w4 stored TRANSPOSED as (round8(action), 128-pad fc3); b4 as (a_pad, 1)."""
    w1, w2, w3, w4 = (params[f"w{i}"] for i in range(1, 5))
    b1, b2, b3, b4 = (params[f"b{i}"] for i in range(1, 5))

    def pad2(a, r0, r1):
        return (jnp.zeros((r0, r1), jnp.bfloat16)
                .at[:a.shape[0], :a.shape[1]].set(a.astype(jnp.bfloat16)))

    d_in = _round_up(w1.shape[0], 8)
    f1 = _round_up(w1.shape[1], LANE)
    f2 = _round_up(w2.shape[1], LANE)
    f3 = _round_up(w3.shape[1], LANE)
    a_pad = _round_up(w4.shape[1], 8)

    return {
        "w1": pad2(w1, d_in, f1),
        "w2": pad2(w2, f1, f2),
        "w3": pad2(w3, f2, f3),
        "w4t": pad2(w4.T, a_pad, f3),     # transposed: (a_pad, f3)
        "b1": jnp.zeros((1, f1), jnp.float32).at[:, :b1.shape[1]].set(b1),
        "b2": jnp.zeros((1, f2), jnp.float32).at[:, :b2.shape[1]].set(b2),
        "b3": jnp.zeros((1, f3), jnp.float32).at[:, :b3.shape[1]].set(b3),
        "b4": jnp.zeros((a_pad, 1), jnp.float32).at[:b4.shape[1], :].set(b4.T),
    }


def reference_forward(x, params):
    h = jnp.maximum(x @ params["w1"] + params["b1"], 0.0)
    h = jnp.maximum(h @ params["w2"] + params["b2"], 0.0)
    h = jnp.maximum(h @ params["w3"] + params["b3"], 0.0)
    return h @ params["w4"] + params["b4"]


if __name__ == "__main__":
    # Small shapes consistent with the module: state_size=8, action_size=4,
    # fc1=32, fc2=64, fc3=32, batch=8.
    state_size, action_size = 8, 4
    fc1_lay, fc2_lay, fc3_lay = 32, 64, 32
    batch = 8

    key = jax.random.PRNGKey(0)
    key, kx = jax.random.split(key)
    params = init_params(key, state_size, action_size, fc1_lay, fc2_lay, fc3_lay)
    padded = pad_params(params)
    x = jax.random.normal(kx, (batch, state_size), jnp.float32)

    out = dq_network_forward(x, padded, action_size=action_size)
    out = jax.block_until_ready(out)

    ref = reference_forward(x, params)
    assert out.shape == (batch, action_size)
    # bf16 MXU inputs with f32 accumulation -> compare to the f32 reference loosely.
    assert jnp.allclose(out, ref, atol=3e-2, rtol=3e-2), (
        float(jnp.max(jnp.abs(out - ref))))

    print("KERNEL_OK")
</pallas_src>

<mosaic_0001>
module attributes {stable_mosaic.version = 11 : i64} {
  func.func @_mlp_kernel(%arg0: i32, %arg1: memref<16x8xbf16, #tpu.memory_space<vmem>>, %arg2: memref<8x128xbf16, #tpu.memory_space<vmem>>, %arg3: memref<1x128xf32, #tpu.memory_space<vmem>>, %arg4: memref<128x128xbf16, #tpu.memory_space<vmem>>, %arg5: memref<1x128xf32, #tpu.memory_space<vmem>>, %arg6: memref<128x128xbf16, #tpu.memory_space<vmem>>, %arg7: memref<1x128xf32, #tpu.memory_space<vmem>>, %arg8: memref<8x128xbf16, #tpu.memory_space<vmem>>, %arg9: memref<8x1xf32, #tpu.memory_space<vmem>>, %arg10: memref<1x8x16xf32, #tpu.memory_space<vmem>>) attributes {dimension_semantics = [#tpu.dimension_semantics<parallel>], iteration_bounds = array<i64: 1>, scalar_prefetch = 0 : i64, scratch_operands = 0 : i64, tpu.core_type = #tpu.core_type<tc>, window_params = [{transform_indices = @transform_0, window_bounds = array<i64: 16, 8>}, {pipeline_mode = #tpu.pipeline_mode<synchronous>, transform_indices = @transform_1, window_bounds = array<i64: 8, 128>}, {pipeline_mode = #tpu.pipeline_mode<synchronous>, transform_indices = @transform_2, window_bounds = array<i64: 1, 128>}, {pipeline_mode = #tpu.pipeline_mode<synchronous>, transform_indices = @transform_3, window_bounds = array<i64: 128, 128>}, {pipeline_mode = #tpu.pipeline_mode<synchronous>, transform_indices = @transform_4, window_bounds = array<i64: 1, 128>}, {pipeline_mode = #tpu.pipeline_mode<synchronous>, transform_indices = @transform_5, window_bounds = array<i64: 128, 128>}, {pipeline_mode = #tpu.pipeline_mode<synchronous>, transform_indices = @transform_6, window_bounds = array<i64: 1, 128>}, {pipeline_mode = #tpu.pipeline_mode<synchronous>, transform_indices = @transform_7, window_bounds = array<i64: 8, 128>}, {pipeline_mode = #tpu.pipeline_mode<synchronous>, transform_indices = @transform_8, window_bounds = array<i64: 8, 1>}, {transform_indices = @transform_9, window_bounds = array<i64: 1, 8, 16>}]} {
    %c0 = arith.constant 0 : index
    %c0_0 = arith.constant 0 : index
    %0 = vector.load %arg1[%c0, %c0_0] : memref<16x8xbf16, #tpu.memory_space<vmem>>, vector<16x8xbf16>
    %c0_1 = arith.constant 0 : index
    %c0_2 = arith.constant 0 : index
    %1 = vector.load %arg2[%c0_1, %c0_2] : memref<8x128xbf16, #tpu.memory_space<vmem>>, vector<8x128xbf16>
    %cst = arith.constant dense<0.000000e+00> : vector<16x128xf32>
    %2 = tpu.matmul %0, %1, %cst {dimension_numbers = #tpu.dot_dimension_numbers<[1], [0], [0], [1], [0, 0, 1, 1], [], []>} : vector<16x8xbf16>, vector<8x128xbf16>, vector<16x128xf32> -> vector<16x128xf32>
    %c0_3 = arith.constant 0 : index
    %c0_4 = arith.constant 0 : index
    %3 = vector.load %arg3[%c0_3, %c0_4] : memref<1x128xf32, #tpu.memory_space<vmem>>, vector<1x128xf32>
    %4 = vector.broadcast %3 : vector<1x128xf32> to vector<16x128xf32>
    %5 = arith.addf %2, %4 : vector<16x128xf32>
    %cst_5 = arith.constant 0.000000e+00 : f32
    %6 = vector.broadcast %cst_5 : f32 to vector<16x128xf32>
    %7 = arith.maximumf %5, %6 : vector<16x128xf32>
    %8 = arith.truncf %7 : vector<16x128xf32> to vector<16x128xbf16>
    %c0_6 = arith.constant 0 : index
    %c0_7 = arith.constant 0 : index
    %9 = vector.load %arg4[%c0_6, %c0_7] : memref<128x128xbf16, #tpu.memory_space<vmem>>, vector<128x128xbf16>
    %cst_8 = arith.constant dense<0.000000e+00> : vector<16x128xf32>
    %10 = tpu.matmul %8, %9, %cst_8 {dimension_numbers = #tpu.dot_dimension_numbers<[1], [0], [0], [1], [0, 0, 1, 1], [], []>} : vector<16x128xbf16>, vector<128x128xbf16>, vector<16x128xf32> -> vector<16x128xf32>
    %c0_9 = arith.constant 0 : index
    %c0_10 = arith.constant 0 : index
    %11 = vector.load %arg5[%c0_9, %c0_10] : memref<1x128xf32, #tpu.memory_space<vmem>>, vector<1x128xf32>
    %12 = vector.broadcast %11 : vector<1x128xf32> to vector<16x128xf32>
    %13 = arith.addf %10, %12 : vector<16x128xf32>
    %cst_11 = arith.constant 0.000000e+00 : f32
    %14 = vector.broadcast %cst_11 : f32 to vector<16x128xf32>
    %15 = arith.maximumf %13, %14 : vector<16x128xf32>
    %16 = arith.truncf %15 : vector<16x128xf32> to vector<16x128xbf16>
    %c0_12 = arith.constant 0 : index
    %c0_13 = arith.constant 0 : index
    %17 = vector.load %arg6[%c0_12, %c0_13] : memref<128x128xbf16, #tpu.memory_space<vmem>>, vector<128x128xbf16>
    %cst_14 = arith.constant dense<0.000000e+00> : vector<16x128xf32>
    %18 = tpu.matmul %16, %17, %cst_14 {dimension_numbers = #tpu.dot_dimension_numbers<[1], [0], [0], [1], [0, 0, 1, 1], [], []>} : vector<16x128xbf16>, vector<128x128xbf16>, vector<16x128xf32> -> vector<16x128xf32>
    %c0_15 = arith.constant 0 : index
    %c0_16 = arith.constant 0 : index
    %19 = vector.load %arg7[%c0_15, %c0_16] : memref<1x128xf32, #tpu.memory_space<vmem>>, vector<1x128xf32>
    %20 = vector.broadcast %19 : vector<1x128xf32> to vector<16x128xf32>
    %21 = arith.addf %18, %20 : vector<16x128xf32>
    %cst_17 = arith.constant 0.000000e+00 : f32
    %22 = vector.broadcast %cst_17 : f32 to vector<16x128xf32>
    %23 = arith.maximumf %21, %22 : vector<16x128xf32>
    %24 = arith.truncf %23 : vector<16x128xf32> to vector<16x128xbf16>
    %c0_18 = arith.constant 0 : index
    %c0_19 = arith.constant 0 : index
    %25 = vector.load %arg8[%c0_18, %c0_19] : memref<8x128xbf16, #tpu.memory_space<vmem>>, vector<8x128xbf16>
    %cst_20 = arith.constant dense<0.000000e+00> : vector<8x16xf32>
    %26 = tpu.matmul %25, %24, %cst_20 {dimension_numbers = #tpu.dot_dimension_numbers<[1], [1], [0], [0], [0, 0, 1, 0], [], []>} : vector<8x128xbf16>, vector<16x128xbf16>, vector<8x16xf32> -> vector<8x16xf32>
    %c0_21 = arith.constant 0 : index
    %c0_22 = arith.constant 0 : index
    %27 = vector.load %arg9[%c0_21, %c0_22] : memref<8x1xf32, #tpu.memory_space<vmem>>, vector<8x1xf32>
    %28 = vector.broadcast %27 : vector<8x1xf32> to vector<8x16xf32>
    %29 = arith.addf %26, %28 : vector<8x16xf32>
    %c0_23 = arith.constant 0 : index
    %c0_24 = arith.constant 0 : index
    %c0_25 = arith.constant 0 : index
    %30 = vector.load %arg10[%c0_23, %c0_24, %c0_25] : memref<1x8x16xf32, #tpu.memory_space<vmem>>, vector<1x8x16xf32>
    %31 = vector.shape_cast %30 : vector<1x8x16xf32> to vector<8x16xf32>
    %32 = vector.shape_cast %29 : vector<8x16xf32> to vector<1x8x16xf32>
    tpu.vector_store %arg10[%c0_23, %c0_24, %c0_25], %32 {strides = array<i32>} : memref<1x8x16xf32, #tpu.memory_space<vmem>>, vector<1x8x16xf32>,
    return
  }
  func.func @transform_0(%arg0: i32) -> (i32, i32) {
    %c0_i32 = arith.constant 0 : i32
    %c0_i32_0 = arith.constant 0 : i32
    return %arg0, %c0_i32 : i32, i32
  }
  func.func @transform_1(%arg0: i32) -> (i32, i32) {
    %c0_i32 = arith.constant 0 : i32
    %c0_i32_0 = arith.constant 0 : i32
    %c0_i32_1 = arith.constant 0 : i32
    return %c0_i32, %c0_i32_0 : i32, i32
  }
  func.func @transform_2(%arg0: i32) -> (i32, i32) {
    %c0_i32 = arith.constant 0 : i32
    %c0_i32_0 = arith.constant 0 : i32
    %c0_i32_1 = arith.constant 0 : i32
    return %c0_i32, %c0_i32_0 : i32, i32
  }
  func.func @transform_3(%arg0: i32) -> (i32, i32) {
    %c0_i32 = arith.constant 0 : i32
    %c0_i32_0 = arith.constant 0 : i32
    %c0_i32_1 = arith.constant 0 : i32
    return %c0_i32, %c0_i32_0 : i32, i32
  }
  func.func @transform_4(%arg0: i32) -> (i32, i32) {
    %c0_i32 = arith.constant 0 : i32
    %c0_i32_0 = arith.constant 0 : i32
    %c0_i32_1 = arith.constant 0 : i32
    return %c0_i32, %c0_i32_0 : i32, i32
  }
  func.func @transform_5(%arg0: i32) -> (i32, i32) {
    %c0_i32 = arith.constant 0 : i32
    %c0_i32_0 = arith.constant 0 : i32
    %c0_i32_1 = arith.constant 0 : i32
    return %c0_i32, %c0_i32_0 : i32, i32
  }
  func.func @transform_6(%arg0: i32) -> (i32, i32) {
    %c0_i32 = arith.constant 0 : i32
    %c0_i32_0 = arith.constant 0 : i32
    %c0_i32_1 = arith.constant 0 : i32
    return %c0_i32, %c0_i32_0 : i32, i32
  }
  func.func @transform_7(%arg0: i32) -> (i32, i32) {
    %c0_i32 = arith.constant 0 : i32
    %c0_i32_0 = arith.constant 0 : i32
    %c0_i32_1 = arith.constant 0 : i32
    return %c0_i32, %c0_i32_0 : i32, i32
  }
  func.func @transform_8(%arg0: i32) -> (i32, i32) {
    %c0_i32 = arith.constant 0 : i32
    %c0_i32_0 = arith.constant 0 : i32
    %c0_i32_1 = arith.constant 0 : i32
    return %c0_i32, %c0_i32_0 : i32, i32
  }
  func.func @transform_9(%arg0: i32) -> (i32, i32, i32) {
    %c0_i32 = arith.constant 0 : i32
    %c0_i32_0 = arith.constant 0 : i32
    %c0_i32_1 = arith.constant 0 : i32
    return %arg0, %c0_i32, %c0_i32_0 : i32, i32, i32
  }
}

</mosaic_0001>

<bundles_post_ra>
// kernel: dq_network_forward.1
= control target key start
LH: loop header
LB: loop body
LE: loop exit
PB: predicated region body
PF: predicated region fallthrough
CT: control target
= control target key end

     0   :  { %14 = vsyncpa [#allocation3], 0  ;;  %s712_s0 = inlined_call_operand.vmem [shape: bf16[16,8], index: 0, kind: input, shape index: {}]   ;;  %s713_s1 = inlined_call_operand.vmem [shape: bf16[8,128], index: 1, kind: input, shape index: {}]   ;;  %s714_s2 = inlined_call_operand.vmem [shape: f32[1,128], index: 2, kind: input, shape index: {}]   ;;  %s715_s3 = inlined_call_operand.hbm [shape: bf16[128,128], index: 3, kind: input, shape index: {}]   ;;  %s716_s4 = inlined_call_operand.vmem [shape: f32[1,128], index: 4, kind: input, shape index: {}]   ;;  %s717_s5 = inlined_call_operand.hbm [shape: bf16[128,128], index: 5, kind: input, shape index: {}]   ;;  %s718_s6 = inlined_call_operand.vmem [shape: f32[1,128], index: 6, kind: input, shape index: {}]   ;;  %s719_s7 = inlined_call_operand.vmem [shape: bf16[8,128], index: 7, kind: input, shape index: {}]   ;;  %s720_s8 = inlined_call_operand.vmem [shape: f32[8,1], index: 8, kind: input, shape index: {}]   ;;  %s721_s9 = inlined_call_operand.vmem [shape: f32[1,8,16], index: 9, kind: output, shape index: {}]  }
   0x1   :  { %15 = vsyncpa [#allocation5], 0  ;;  %s581_s30 = smov [#allocation2]   ;;  %s533_s13 = scalar_lea.hbm %s715_s3, 1024 }
   0x2   :  { %s27_s10 = sshll.u32 %s581_s30, 4  ;;  %p534_p0 = scmp.ne.s32.totalorder %s715_s3, %s533_s13  ;;  %s28_s10 = int_to_ptr.vmem [resolvable:$true] %s27_s10 }
   0x3   :  { %p537_p1 = scmp.lt.u32.totalorder %s533_s13, %s715_s3 }
   0x5   :  { %p539_p2 = pnand %p537_p1, %p534_p0 }
   0x7   :  { %542 = shalt.err (!%p539_p2)
}
   0x8   :  { %s543_s18 = scalar_lea.vmem %s28_s10, 1024  ;;  %p548_p4 = scmp.lt.s32.totalorder %s28_s10, %s28_s10 }
   0x9   :  { %p544_p3 = scmp.ne.s32.totalorder %s28_s10, %s543_s18  ;;  %p549_p5 = scmp.lt.s32.totalorder %s543_s18, %s543_s18 }
   0xb   :  { %p550_p6 = por %p549_p5, %p548_p4 }
   0xd   :  { %p551_p7 = pnand %p550_p6, %p544_p3 }
   0xf   :  { %554 = shalt.err (!%p551_p7)
}
  0x10   :  { %s582_s19 = smov 64   ;;  %s583_s20 = smov 4  }
  0x11   :  { %33 = dma.hbm_to_vmem [thread:$0]  %s715_s3, 1024, %s28_s10, [#allocation3], %s582_s19, %s582_s19, %s583_s20  }
  0x12   :  { %s584_s23 = smov [#allocation4]   ;;  %s555_s27 = scalar_lea.hbm %s717_s5, 1024 }
  0x13   :  { %s41_s24 = sshll.u32 %s584_s23, 4  ;;  %p556_p8 = scmp.ne.s32.totalorder %s717_s5, %s555_s27  ;;  %s42_s24 = int_to_ptr.vmem [resolvable:$true] %s41_s24 }
  0x14   :  { %p559_p9 = scmp.lt.u32.totalorder %s555_s27, %s717_s5 }
  0x16   :  { %p561_p10 = pnand %p559_p9, %p556_p8 }
  0x18   :  { %564 = shalt.err (!%p561_p10)
}
  0x19   :  { %s565_s12 = scalar_lea.vmem %s42_s24, 1024  ;;  %p570_p12 = scmp.lt.s32.totalorder %s42_s24, %s42_s24 }
  0x1a   :  { %p566_p11 = scmp.ne.s32.totalorder %s42_s24, %s565_s12  ;;  %p571_p13 = scmp.lt.s32.totalorder %s565_s12, %s565_s12 }
  0x1c   :  { %p572_p0 = por %p571_p13, %p570_p12 }
  0x1e   :  { %p573_p1 = pnand %p572_p0, %p566_p11 }
  0x20   :  { %576 = shalt.err (!%p573_p1)
}
  0x21   :  { %47 = dma.hbm_to_vmem [thread:$0]  %s717_s5, 1024, %s42_s24, [#allocation5], %s582_s19, %s582_s19, %s583_s20  }
  0x22   :  { %577 = dma.done.wait [#allocation3], 1024  }
  0x23   :  { %578 = vsyncadd [#allocation3], 4294966272 }
  0x24   :  { %579 = dma.done.wait [#allocation5], 1024  }
  0x25   :  { %580 = vsyncadd [#allocation5], 4294966272  ;;  %v585_v0 = vmov 0.0   ;;  %vm586_vm0 = vmmov 0   ;;  %vm80_vm1 = vcmask 1043456   ;;  %v516_v3 = vld [vmem:[%s712_s0] sm:$0xff]  }
  0x26   :  { %456 = vmatprep.subr.bf16.mxu0 %v585_v0  ;;  %458 = vmatprep.mubr.msk.bf16.mxu0 %vm586_vm0, %v585_v0  ;;  %v63_v1 = vld [vmem:[%s713_s1] sm:$0xf]  ;;  %vm76_vm2 = vcmask 64512   ;;  %v518_v5 = vld [vmem:[#allocation2 + $0x8] sm:$0xff]   ;;  %v519_v6 = vld [vmem:[#allocation2 + $0x10] sm:$0xff]   ;;  %v587_v41 = vmov 0  }
  0x27   :  { %462 = vmatprep.subr.bf16.mxu1 %v585_v0  ;;  %478 = vmatprep.mubr.msk.bf16.mxu1 %vm586_vm0, %v585_v0  ;;  %v82_v2 = vsel %vm80_vm1, %v63_v1, 0  ;;  %v517_v4 = vld [vmem:[#allocation2] sm:$0xff]   ;;  %v520_v7 = vld [vmem:[#allocation2 + $0x18] sm:$0xff]   ;;  %v522_v9 = vld [vmem:[#allocation2 + $0x28] sm:$0xff]   ;;  %vm405_vm3 = vcmask 130048  }
  0x28   :  { %457 = vmatpush3.bf16.msra.mxu0 %v82_v2  ;;  %463 = vmatpush3.bf16.msra.mxu1 %v517_v4  ;;  %v521_v8 = vld [vmem:[#allocation2 + $0x20] sm:$0xff]   ;;  %v523_v10 = vld [vmem:[#allocation2 + $0x30] sm:$0xff]   ;;  %v524_v11 = vld [vmem:[#allocation2 + $0x38] sm:$0xff]  }
  0x29   :  { %482 = vmatprep.subr.bf16.mxu0 %v585_v0  ;;  %464 = vmatprep.subr.bf16.mxu1 %v585_v0  ;;  %v525_v12 = vld [vmem:[#allocation4] sm:$0xff]   ;;  %v526_v13 = vld [vmem:[#allocation4 + $0x8] sm:$0xff]   ;;  %v527_v14 = vld [vmem:[#allocation4 + $0x10] sm:$0xff]  }
  0x2a   :  { %v528_v15 = vld [vmem:[#allocation4 + $0x18] sm:$0xff]   ;;  %v529_v16 = vld [vmem:[#allocation4 + $0x20] sm:$0xff]   ;;  %v530_v17 = vld [vmem:[#allocation4 + $0x28] sm:$0xff]   ;;  %515 = vset.pattern.permute.xlu0 %v587_v41 }
  0x2b   :  { %459 = vmatmul.mubr.msk.bf16.vlgmr.msra.gmra.mrb[0].mxu0 %vm76_vm2, %v516_v3  ;;  %v413_v18 = vld [vmem:[%s714_s2] ss:$0 sm:$0xff]  ;;  %v531_v28 = vld [vmem:[#allocation4 + $0x30] sm:$0xff]   ;;  %v532_v29 = vld [vmem:[#allocation4 + $0x38] sm:$0xff]  }
  0x2c   :  { %498 = vmatprep.mubr.msk.bf16.mxu0 %vm586_vm0, %v585_v0  ;;  %465 = vmatpush3.bf16.msra.mxu1 %v518_v5  ;;  %v416_v30 = vld [vmem:[%s716_s4] ss:$0 sm:$0xff] }
  0x2d   :  { %466 = vmatprep.subr.bf16.mxu1 %v585_v0  ;;  %483 = vmatpush3.bf16.msra.mxu0 %v525_v12  ;;  %v359_v40 = vld [vmem:[%s720_s8] sm:$0xff] }
  0x2e   :  { %484 = vmatprep.subr.bf16.mxu0 %v585_v0  ;;  %362 = vperm.xlu0 %515, %v359_v40   ;;  %v425_v42 = vld [vmem:[%s718_s6] ss:$0 sm:$0xff] }
  0x2f   :  { %v358_v52 = vld [vmem:[%s719_s7] sm:$0xf] }
  0x30   :  { %467 = vmatpush3.bf16.msra.mxu1 %v519_v6 }
  0x31   :  { %468 = vmatprep.subr.bf16.mxu1 %v585_v0  ;;  %485 = vmatpush3.bf16.msra.mxu0 %v526_v13 }
  0x32   :  { %486 = vmatprep.subr.bf16.mxu0 %v585_v0 }
  0x34   :  { %469 = vmatpush3.bf16.msra.mxu1 %v520_v7 }
  0x35   :  { %470 = vmatprep.subr.bf16.mxu1 %v585_v0  ;;  %487 = vmatpush3.bf16.msra.mxu0 %v527_v14 }
  0x36   :  { %488 = vmatprep.subr.bf16.mxu0 %v585_v0 }
  0x38   :  { %471 = vmatpush3.bf16.msra.mxu1 %v521_v8 }
  0x39   :  { %472 = vmatprep.subr.bf16.mxu1 %v585_v0  ;;  %489 = vmatpush3.bf16.msra.mxu0 %v528_v15 }
  0x3a   :  { %490 = vmatprep.subr.bf16.mxu0 %v585_v0 }
  0x3c   :  { %473 = vmatpush3.bf16.msra.mxu1 %v522_v9 }
  0x3d   :  { %474 = vmatprep.subr.bf16.mxu1 %v585_v0  ;;  %491 = vmatpush3.bf16.msra.mxu0 %v529_v16 }
  0x3e   :  { %492 = vmatprep.subr.bf16.mxu0 %v585_v0 }
  0x40   :  { %475 = vmatpush3.bf16.msra.mxu1 %v523_v10 }
  0x41   :  { %476 = vmatprep.subr.bf16.mxu1 %v585_v0  ;;  %493 = vmatpush3.bf16.msra.mxu0 %v530_v17 }
  0x42   :  { %494 = vmatprep.subr.bf16.mxu0 %v585_v0 }
  0x44   :  { %477 = vmatpush3.bf16.msra.mxu1 %v524_v11 }
  0x45   :  { %502 = vmatprep.subr.bf16.mxu1 %v585_v0  ;;  %495 = vmatpush3.bf16.msra.mxu0 %v531_v28 }
  0x46   :  { %496 = vmatprep.subr.bf16.mxu0 %v585_v0 }
  0x49   :  { %497 = vmatpush3.bf16.msra.mxu0 %v532_v29 }
  0xad   :  { %v363_v53 = vpop.permute.xlu0 %362 }
  0xfe   :  { %v118_v19 = vpop.f32.mrb[0].mxu0 }
  0xff   :  { %v119_v20 = vadd.f32 %v413_v18, %v118_v19  ;;  %v460_v21 = vpop.f32.mrb[1].mxu0 }
 0x100   :  { %v121_v22 = vpop.f32.mrb[2].mxu0 }
 0x101   :  { %v122_v23 = vadd.f32 %v413_v18, %v121_v22  ;;  %v461_v24 = vpop.f32.mrb[3].mxu0  ;;  %v125_v25 = vmax.f32 %v119_v20, 0.0 }
 0x103   :  { %v126_v26 = vmax.f32 %v122_v23, 0.0 }
 0x105   :  { %v127_v27 = vpack.c.bf16 %v126_v26, %v125_v25 }
 0x107   :  { %479 = vmatmul.mubr.bf16.vlgmr.msra.gmra.mrb[0].mxu1 %v127_v27 }
 0x108   :  { %504 = vmatprep.mubr.msk.bf16.mxu1 %vm586_vm0, %v585_v0 }
 0x1da   :  { %v233_v31 = vpop.f32.mrb[0].mxu1 }
 0x1db   :  { %v234_v32 = vadd.f32 %v416_v30, %v233_v31  ;;  %v480_v33 = vpop.f32.mrb[1].mxu1 }
 0x1dc   :  { %v236_v34 = vpop.f32.mrb[2].mxu1 }
 0x1dd   :  { %v237_v35 = vadd.f32 %v416_v30, %v236_v34  ;;  %v481_v36 = vpop.f32.mrb[3].mxu1  ;;  %v240_v37 = vmax.f32 %v234_v32, 0.0 }
 0x1df   :  { %v241_v38 = vmax.f32 %v237_v35, 0.0 }
 0x1e1   :  { %v242_v39 = vpack.c.bf16 %v241_v38, %v240_v37 }
 0x1e3   :  { %499 = vmatmul.mubr.bf16.vlgmr.msra.gmra.mrb[4].mxu0 %v242_v39 }
 0x2b6   :  { %v348_v43 = vpop.f32.mrb[4].mxu0 }
 0x2b7   :  { %v349_v44 = vadd.f32 %v425_v42, %v348_v43  ;;  %v500_v45 = vpop.f32.mrb[5].mxu0 }
 0x2b8   :  { %v351_v46 = vpop.f32.mrb[6].mxu0 }
 0x2b9   :  { %v352_v47 = vadd.f32 %v425_v42, %v351_v46  ;;  %v501_v48 = vpop.f32.mrb[7].mxu0  ;;  %v355_v49 = vmax.f32 %v349_v44, 0.0 }
 0x2bb   :  { %v356_v50 = vmax.f32 %v352_v47, 0.0 }
 0x2bd   :  { %v357_v51 = vpack.c.bf16 %v356_v50, %v355_v49 }
 0x2bf   :  { %503 = vmatpush3.bf16.xpose.msra.mxu1 %v357_v51 }
 0x2c6   :  { %505 = vmatmul.mubr.bf16.vlgmr.msra.gmra.mrb[4].mxu1 %v358_v52 }
 0x399   :  { %v399_v54 = vpop.f32.mrb[4].mxu1 }
 0x39a   :  { %v400_v55 = vadd.f32 %v399_v54, %v363_v53  ;;  %v506_v56 = vpop.f32.mrb[5].mxu1 }
 0x39b   :  { %v402_v57 = vpop.f32.mrb[6].mxu1 }
 0x39c   :  { %406 = vst.msk [vmem:[%s721_s9] sm:$0xff] %vm405_vm3, %v400_v55  ;;  %v507_v58 = vpop.f32.mrb[7].mxu1 }
 0x39d   :  { %411 = vsyncpa [#allocation3], 1 }
 0x39e   :  { %412 = vsyncpa [#allocation5], 1 }

</bundles_post_ra>
